<compile_context>
chip_gen: v7x
topology: tpu7x:2x2x1
jax: 0.10.0
libtpu: 0.0.40
codegen_flags: <defaults>
</compile_context>

<pallas_src>
import functools

import jax
import jax.numpy as jnp
from jax.experimental import pallas as pl
from jax.experimental.pallas import tpu as pltpu


def _round_up(x, m):
    return (x + m - 1) // m * m


def _pick_tile(dim, candidates):
    for c in candidates:
        if dim % c == 0:
            return c
    return dim


# ----------------------------------------------------------------------------
# Kernel 1 (fused): logits tile = x @ w^T  +  online log-sum-exp over vocab.
#   grid = (M/tm, N/tn, K/tk); i parallel, j (vocab) and k (hidden) sequential.
#   Outputs: logits [M, N] f32  and  lse [M, 1] f32 (masked to vocab_size).
# ----------------------------------------------------------------------------
def _logits_lse_kernel(x_ref, w_ref, logits_ref, lse_ref,
                       acc_ref, m_ref, l_ref, *, tn, vocab_size):
    j = pl.program_id(1)
    k = pl.program_id(2)

    @pl.when(k == 0)
    def _():
        acc_ref[...] = jnp.zeros_like(acc_ref)

    # x_ref: [tm, tk], w_ref: [tn, tk] -> contract last dims (no w.T in HBM).
    acc_ref[...] += jax.lax.dot_general(
        x_ref[...], w_ref[...],
        dimension_numbers=(((1,), (1,)), ((), ())),
        preferred_element_type=jnp.float32,
    )

    @pl.when(k == pl.num_programs(2) - 1)
    def _():
        logits = acc_ref[...]
        logits_ref[...] = logits

        # Exclude padded vocab columns (>= vocab_size) from the softmax stats.
        col = j * tn + jax.lax.broadcasted_iota(jnp.int32, logits.shape, 1)
        masked = jnp.where(col < vocab_size, logits, -jnp.inf)

        @pl.when(j == 0)
        def _():
            m_ref[...] = jnp.full(m_ref.shape, -jnp.inf, dtype=m_ref.dtype)
            l_ref[...] = jnp.zeros(l_ref.shape, dtype=l_ref.dtype)

        m_prev = m_ref[...]
        m_new = jnp.maximum(m_prev, jnp.max(masked, axis=-1, keepdims=True))
        l_ref[...] = l_ref[...] * jnp.exp(m_prev - m_new) + jnp.sum(
            jnp.exp(masked - m_new), axis=-1, keepdims=True)
        m_ref[...] = m_new

        @pl.when(j == pl.num_programs(1) - 1)
        def _():
            lse_ref[...] = m_ref[...] + jnp.log(l_ref[...])


def lm_head_logits_and_lse(x, w, vocab_size, *, tn=512, tk_cap=2048):
    """x: [M, K], w: [N, K] -> (logits [Mp, Np] f32, lse [Mp, 1] f32).

    Mp/Np are padded up (rows with zeros, vocab to a 128 multiple); callers
    slice back to the original M / vocab_size.
    """
    M, K = x.shape
    N, K2 = w.shape
    assert K == K2

    # bf16 operands for the MXU when the LM head is stored in bf16 (f32 acc).
    if w.dtype == jnp.bfloat16:
        x = x.astype(jnp.bfloat16)
    elif x.dtype != w.dtype:
        x = x.astype(w.dtype)

    # Token tile: multiple of 8 sublanes, capped at 128; pad rows with zeros.
    tm = min(128, _round_up(M, 8))
    mp = _round_up(M, tm)
    if mp != M:
        x = jnp.pad(x, ((0, mp - M), (0, 0)))

    # Vocab tile: lane-dense 128 multiple (pad the rare non-128 vocab).
    if N % 128 != 0:
        w = jnp.pad(w, ((0, _round_up(N, 128) - N), (0, 0)))
        N = w.shape[0]
    tn = _pick_tile(N, [tn, 512, 256, 128])

    # Hidden (reduction) tile: full K when it fits, else largest 128 multiple.
    tk = K if K <= tk_cap else _pick_tile(K, [2048, 1024, 512, 256, 128])

    grid = (mp // tm, N // tn, K // tk)
    kernel = functools.partial(_logits_lse_kernel, tn=tn, vocab_size=vocab_size)
    logits, lse = pl.pallas_call(
        kernel,
        out_shape=(
            jax.ShapeDtypeStruct((mp, N), jnp.float32),
            jax.ShapeDtypeStruct((mp, 1), jnp.float32),
        ),
        grid_spec=pltpu.PrefetchScalarGridSpec(
            num_scalar_prefetch=0,
            grid=grid,
            in_specs=[
                pl.BlockSpec((tm, tk), lambda i, j, k: (i, k)),
                pl.BlockSpec((tn, tk), lambda i, j, k: (j, k)),
            ],
            out_specs=[
                pl.BlockSpec((tm, tn), lambda i, j, k: (i, j)),
                pl.BlockSpec((tm, 1), lambda i, j, k: (i, 0)),
            ],
            scratch_shapes=[
                pltpu.VMEM((tm, tn), jnp.float32),   # f32 accumulator
                pltpu.VMEM((tm, 1), jnp.float32),    # running max
                pltpu.VMEM((tm, 1), jnp.float32),    # running sum-exp
            ],
        ),
        compiler_params=pltpu.CompilerParams(
            dimension_semantics=("parallel", "arbitrary", "arbitrary"),
            # Explicit budget; stays under v7x's 64 MiB physical VMEM while
            # giving v5e/v6e headroom over the 32 MiB default scoped limit.
            vmem_limit_bytes=48 * 1024 * 1024,
        ),
    )(x, w)
    return logits, lse


# ----------------------------------------------------------------------------
# Kernel 2: logprobs = logits - lse (vocab-tiled elementwise pass).
# ----------------------------------------------------------------------------
def _normalize_kernel(logits_ref, lse_ref, o_ref):
    o_ref[...] = logits_ref[...] - lse_ref[...]


def log_softmax_from_lse(logits, lse):
    """logits: [Mp, Np] f32, lse: [Mp, 1] f32 -> logprobs [Mp, Np] f32."""
    mp, np_ = logits.shape
    tm = _pick_tile(mp, [256, 128, 64, 32, 16, 8])
    tv = _pick_tile(np_, [4096, 2048, 1024, 512, 256, 128])
    return pl.pallas_call(
        _normalize_kernel,
        out_shape=jax.ShapeDtypeStruct((mp, np_), jnp.float32),
        grid_spec=pltpu.PrefetchScalarGridSpec(
            num_scalar_prefetch=0,
            grid=(mp // tm, np_ // tv),
            in_specs=[
                pl.BlockSpec((tm, tv), lambda i, j: (i, j)),
                pl.BlockSpec((tm, 1), lambda i, j: (i, 0)),
            ],
            out_specs=pl.BlockSpec((tm, tv), lambda i, j: (i, j)),
        ),
        compiler_params=pltpu.CompilerParams(
            dimension_semantics=("parallel", "parallel"),
            vmem_limit_bytes=48 * 1024 * 1024,
        ),
    )(logits, lse)


# ----------------------------------------------------------------------------
# LogitsProcessor.forward (prefill / EXTEND mode, tp_size == 1)
# ----------------------------------------------------------------------------
def logits_processor_forward(
    input_ids,          # [T] int32
    hidden_states,      # [T, H]
    weight,             # [V_padded, H] lm-head weight (rows are vocab)
    extend_seq_lens,    # [B] int32
    extend_start_loc,   # [B] int32
    top_logprobs_nums,  # python list[int], static
    vocab_size,         # int, static
    return_logprob=True,
):
    # TODO(synk): ForwardMode.DECODE branch and tensor_model_parallel_all_gather
    # (tp_size > 1) are not implemented; this covers EXTEND with tp_size == 1.
    T = hidden_states.shape[0]

    last_index = jnp.cumsum(extend_seq_lens.astype(jnp.int32)) - 1

    if not return_logprob:
        last_hidden = hidden_states[last_index]
        nb = last_hidden.shape[0]
        logits_p, _ = lm_head_logits_and_lse(last_hidden, weight, vocab_size)
        last_logits = logits_p[:nb, :vocab_size].astype(hidden_states.dtype)
        return last_logits, (None, None, None, None, None)

    # One fused sweep over the LM head: logits for every token + row-wise lse.
    logits_p, lse_p = lm_head_logits_and_lse(hidden_states, weight, vocab_size)

    # last_logits reuses all_logits -> no second pass over the [V, H] weight.
    last_logits = logits_p[last_index, :vocab_size].astype(hidden_states.dtype)

    # all_logprobs = log_softmax(all_logits) using the precomputed lse.
    all_logprobs = log_softmax_from_lse(logits_p, lse_p)[:T, :vocab_size]

    # Top-k logprobs (original builds Python lists on CPU; dense arrays here).
    return_top_logprob = any(x > 0 for x in top_logprobs_nums)
    if return_top_logprob:
        max_k = max(top_logprobs_nums)
        # TODO(synk): a vocab-tiled partial top-k inside the softmax sweep would
        # avoid this extra full [T, V] pass; kept as lax.top_k for clarity.
        topk_vals, topk_idx = jax.lax.top_k(all_logprobs, max_k)
        prefill_top_logprobs = (topk_vals, topk_idx)
        decode_top_logprobs = (topk_vals[last_index], topk_idx[last_index])
    else:
        prefill_top_logprobs = decode_top_logprobs = None

    last_logprobs = all_logprobs[last_index]

    # prefill_token_logprobs = all_logprobs[arange(T), cat(input_ids[1:], [0])]
    next_ids = jnp.concatenate(
        [input_ids[1:], jnp.zeros((1,), dtype=input_ids.dtype)]
    )
    prefill_token_logprobs = all_logprobs[jnp.arange(T), next_ids]

    # _get_normalized_prompt_logprobs
    logprobs_cumsum = jnp.cumsum(prefill_token_logprobs, dtype=jnp.float32)
    start = jnp.clip(extend_start_loc.astype(jnp.int32), 0, T - 1)
    end = jnp.clip(
        extend_start_loc.astype(jnp.int32) + extend_seq_lens.astype(jnp.int32) - 2,
        0,
        T - 1,
    )
    sum_logp = (
        logprobs_cumsum[end] - logprobs_cumsum[start] + prefill_token_logprobs[start]
    )
    normalized_prompt_logprobs = sum_logp / jnp.maximum(
        extend_seq_lens.astype(jnp.float32) - 1.0, 1.0
    )

    return last_logits, (
        prefill_token_logprobs,
        normalized_prompt_logprobs,
        prefill_top_logprobs,
        decode_top_logprobs,
        last_logprobs,
    )


# ----------------------------------------------------------------------------
if __name__ == "__main__":
    key = jax.random.PRNGKey(0)
    k1, k2, k3 = jax.random.split(key, 3)

    # Small shapes: 2 sequences with extend lens [3, 5] -> T = 8 tokens.
    H = 32          # hidden size
    V = 256         # vocab size (also padded vocab here)
    extend_seq_lens = jnp.array([3, 5], dtype=jnp.int32)
    extend_start_loc = jnp.array([0, 3], dtype=jnp.int32)
    T = int(jnp.sum(extend_seq_lens))
    top_logprobs_nums = [2, 3]

    hidden_states = jax.random.normal(k1, (T, H), dtype=jnp.float32)
    weight = jax.random.normal(k2, (V, H), dtype=jnp.float32) * 0.05
    input_ids = jax.random.randint(k3, (T,), 0, V, dtype=jnp.int32)

    last_logits, (
        prefill_token_logprobs,
        normalized_prompt_logprobs,
        prefill_top_logprobs,
        decode_top_logprobs,
        last_logprobs,
    ) = logits_processor_forward(
        input_ids,
        hidden_states,
        weight,
        extend_seq_lens,
        extend_start_loc,
        top_logprobs_nums,
        vocab_size=V,
        return_logprob=True,
    )
    jax.block_until_ready(last_logits)
    jax.block_until_ready(last_logprobs)

    # Also exercise the return_logprob=False path (separate small matmul).
    last_logits_nl, _ = logits_processor_forward(
        input_ids,
        hidden_states,
        weight,
        extend_seq_lens,
        extend_start_loc,
        top_logprobs_nums,
        vocab_size=V,
        return_logprob=False,
    )
    jax.block_until_ready(last_logits_nl)

    # Sanity check against a plain-JAX reference.
    last_index = jnp.cumsum(extend_seq_lens) - 1
    ref_last_logits = hidden_states[last_index] @ weight.T
    ref_all_logprobs = jax.nn.log_softmax(hidden_states @ weight.T, axis=-1)
    assert jnp.allclose(last_logits, ref_last_logits, atol=1e-4, rtol=1e-4)
    assert jnp.allclose(last_logits_nl, ref_last_logits, atol=1e-4, rtol=1e-4)
    assert jnp.allclose(last_logprobs, ref_all_logprobs[last_index], atol=1e-4, rtol=1e-4)
    next_ids = jnp.concatenate([input_ids[1:], jnp.zeros((1,), jnp.int32)])
    ref_ptl = ref_all_logprobs[jnp.arange(T), next_ids]
    assert jnp.allclose(prefill_token_logprobs, ref_ptl, atol=1e-4, rtol=1e-4)

    print("KERNEL_OK")
</pallas_src>

<mosaic_0001>
module attributes {stable_mosaic.version = 11 : i64} {
  func.func @_logits_lse_kernel(%arg0: i32, %arg1: i32, %arg2: i32, %arg3: memref<8x32xf32, #tpu.memory_space<vmem>>, %arg4: memref<256x32xf32, #tpu.memory_space<vmem>>, %arg5: memref<8x256xf32, #tpu.memory_space<vmem>>, %arg6: memref<8x1xf32, #tpu.memory_space<vmem>>, %arg7: memref<8x256xf32, #tpu.memory_space<vmem>>, %arg8: memref<8x1xf32, #tpu.memory_space<vmem>>, %arg9: memref<8x1xf32, #tpu.memory_space<vmem>>) attributes {dimension_semantics = [#tpu.dimension_semantics<parallel>, #tpu.dimension_semantics<arbitrary>, #tpu.dimension_semantics<arbitrary>], iteration_bounds = array<i64: 1, 1, 1>, scalar_prefetch = 0 : i64, scratch_operands = 3 : i64, tpu.core_type = #tpu.core_type<tc>, window_params = [{transform_indices = @transform_0, window_bounds = array<i64: 8, 32>}, {transform_indices = @transform_1, window_bounds = array<i64: 256, 32>}, {transform_indices = @transform_2, window_bounds = array<i64: 8, 256>}, {transform_indices = @transform_3, window_bounds = array<i64: 8, 1>}]} {
    %c0_i32 = arith.constant 0 : i32
    %0 = arith.cmpi eq, %arg2, %c0_i32 : i32
    %1 = arith.extui %0 : i1 to i32
    %c0_i32_0 = arith.constant 0 : i32
    %2 = arith.cmpi ne, %1, %c0_i32_0 : i32
    scf.if %2 {
      %cst_10 = arith.constant 0.000000e+00 : f32
      %12 = vector.broadcast %cst_10 : f32 to vector<8x256xf32>
      %c0_11 = arith.constant 0 : index
      %c0_12 = arith.constant 0 : index
      %13 = vector.load %arg7[%c0_11, %c0_12] : memref<8x256xf32, #tpu.memory_space<vmem>>, vector<8x256xf32>
      tpu.vector_store %arg7[%c0_11, %c0_12], %12 {strides = array<i32>} : memref<8x256xf32, #tpu.memory_space<vmem>>, vector<8x256xf32>,
    } else {
    }
    %c0 = arith.constant 0 : index
    %c0_1 = arith.constant 0 : index
    %3 = vector.load %arg7[%c0, %c0_1] : memref<8x256xf32, #tpu.memory_space<vmem>>, vector<8x256xf32>
    %c0_2 = arith.constant 0 : index
    %c0_3 = arith.constant 0 : index
    %4 = vector.load %arg3[%c0_2, %c0_3] : memref<8x32xf32, #tpu.memory_space<vmem>>, vector<8x32xf32>
    %c0_4 = arith.constant 0 : index
    %c0_5 = arith.constant 0 : index
    %5 = vector.load %arg4[%c0_4, %c0_5] : memref<256x32xf32, #tpu.memory_space<vmem>>, vector<256x32xf32>
    %cst = arith.constant dense<0.000000e+00> : vector<8x256xf32>
    %6 = tpu.matmul %4, %5, %cst {dimension_numbers = #tpu.dot_dimension_numbers<[1], [1], [0], [0], [0, 0, 1, 0], [], []>} : vector<8x32xf32>, vector<256x32xf32>, vector<8x256xf32> -> vector<8x256xf32>
    %7 = arith.addf %3, %6 : vector<8x256xf32>
    %c0_6 = arith.constant 0 : index
    %c0_7 = arith.constant 0 : index
    %8 = vector.load %arg7[%c0_6, %c0_7] : memref<8x256xf32, #tpu.memory_space<vmem>>, vector<8x256xf32>
    tpu.vector_store %arg7[%c0_6, %c0_7], %7 {strides = array<i32>} : memref<8x256xf32, #tpu.memory_space<vmem>>, vector<8x256xf32>,
    %c0_i32_8 = arith.constant 0 : i32
    %9 = arith.cmpi eq, %arg2, %c0_i32_8 : i32
    %10 = arith.extui %9 : i1 to i32
    %c0_i32_9 = arith.constant 0 : i32
    %11 = arith.cmpi ne, %10, %c0_i32_9 : i32
    scf.if %11 {
      %c0_10 = arith.constant 0 : index
      %c0_11 = arith.constant 0 : index
      %12 = vector.load %arg7[%c0_10, %c0_11] : memref<8x256xf32, #tpu.memory_space<vmem>>, vector<8x256xf32>
      %c0_12 = arith.constant 0 : index
      %c0_13 = arith.constant 0 : index
      %13 = vector.load %arg5[%c0_12, %c0_13] : memref<8x256xf32, #tpu.memory_space<vmem>>, vector<8x256xf32>
      tpu.vector_store %arg5[%c0_12, %c0_13], %12 {strides = array<i32>} : memref<8x256xf32, #tpu.memory_space<vmem>>, vector<8x256xf32>,
      %c256_i32 = arith.constant 256 : i32
      %14 = arith.muli %arg1, %c256_i32 : i32
      %15 = tpu.iota {dimensions = array<i32: 1>} : vector<8x256xi32>
      %16 = vector.broadcast %14 : i32 to vector<8x256xi32>
      %17 = arith.addi %16, %15 : vector<8x256xi32>
      %c256_i32_14 = arith.constant 256 : i32
      %18 = vector.broadcast %c256_i32_14 : i32 to vector<8x256xi32>
      %19 = arith.cmpi slt, %17, %18 : vector<8x256xi32>
      %cst_15 = arith.constant 0xFF800000 : f32
      %20 = vector.broadcast %cst_15 : f32 to vector<8x256xf32>
      %21 = arith.select %19, %12, %20 : vector<8x256xi1>, vector<8x256xf32>
      %c0_i32_16 = arith.constant 0 : i32
      %22 = arith.cmpi eq, %arg1, %c0_i32_16 : i32
      %23 = arith.extui %22 : i1 to i32
      %c0_i32_17 = arith.constant 0 : i32
      %24 = arith.cmpi ne, %23, %c0_i32_17 : i32
      scf.if %24 {
        %cst_30 = arith.constant 0xFF800000 : f32
        %44 = vector.broadcast %cst_30 : f32 to vector<8x1xf32>
        %c0_31 = arith.constant 0 : index
        %c0_32 = arith.constant 0 : index
        %45 = vector.load %arg8[%c0_31, %c0_32] : memref<8x1xf32, #tpu.memory_space<vmem>>, vector<8x1xf32>
        tpu.vector_store %arg8[%c0_31, %c0_32], %44 {strides = array<i32>} : memref<8x1xf32, #tpu.memory_space<vmem>>, vector<8x1xf32>,
        %cst_33 = arith.constant 0.000000e+00 : f32
        %46 = vector.broadcast %cst_33 : f32 to vector<8x1xf32>
        %c0_34 = arith.constant 0 : index
        %c0_35 = arith.constant 0 : index
        %47 = vector.load %arg9[%c0_34, %c0_35] : memref<8x1xf32, #tpu.memory_space<vmem>>, vector<8x1xf32>
        tpu.vector_store %arg9[%c0_34, %c0_35], %46 {strides = array<i32>} : memref<8x1xf32, #tpu.memory_space<vmem>>, vector<8x1xf32>,
      } else {
      }
      %c0_18 = arith.constant 0 : index
      %c0_19 = arith.constant 0 : index
      %25 = vector.load %arg8[%c0_18, %c0_19] : memref<8x1xf32, #tpu.memory_space<vmem>>, vector<8x1xf32>
      %cst_20 = arith.constant dense<0xFF800000> : vector<8xf32>
      %26 = vector.multi_reduction <maximumf>, %21, %cst_20 [1] : vector<8x256xf32> to vector<8xf32>
      %27 = vector.shape_cast %26 : vector<8xf32> to vector<8x1xf32>
      %28 = arith.maximumf %25, %27 : vector<8x1xf32>
      %c0_21 = arith.constant 0 : index
      %c0_22 = arith.constant 0 : index
      %29 = vector.load %arg9[%c0_21, %c0_22] : memref<8x1xf32, #tpu.memory_space<vmem>>, vector<8x1xf32>
      %30 = arith.subf %25, %28 : vector<8x1xf32>
      %31 = math.exp %30 : vector<8x1xf32>
      %32 = arith.mulf %29, %31 : vector<8x1xf32>
      %33 = vector.broadcast %28 : vector<8x1xf32> to vector<8x256xf32>
      %34 = arith.subf %21, %33 : vector<8x256xf32>
      %35 = math.exp %34 : vector<8x256xf32>
      %cst_23 = arith.constant dense<0.000000e+00> : vector<8xf32>
      %36 = vector.multi_reduction <add>, %35, %cst_23 [1] : vector<8x256xf32> to vector<8xf32>
      %37 = vector.shape_cast %36 : vector<8xf32> to vector<8x1xf32>
      %38 = arith.addf %32, %37 : vector<8x1xf32>
      %c0_24 = arith.constant 0 : index
      %c0_25 = arith.constant 0 : index
      %39 = vector.load %arg9[%c0_24, %c0_25] : memref<8x1xf32, #tpu.memory_space<vmem>>, vector<8x1xf32>
      tpu.vector_store %arg9[%c0_24, %c0_25], %38 {strides = array<i32>} : memref<8x1xf32, #tpu.memory_space<vmem>>, vector<8x1xf32>,
      %c0_26 = arith.constant 0 : index
      %c0_27 = arith.constant 0 : index
      %40 = vector.load %arg8[%c0_26, %c0_27] : memref<8x1xf32, #tpu.memory_space<vmem>>, vector<8x1xf32>
      tpu.vector_store %arg8[%c0_26, %c0_27], %28 {strides = array<i32>} : memref<8x1xf32, #tpu.memory_space<vmem>>, vector<8x1xf32>,
      %c0_i32_28 = arith.constant 0 : i32
      %41 = arith.cmpi eq, %arg1, %c0_i32_28 : i32
      %42 = arith.extui %41 : i1 to i32
      %c0_i32_29 = arith.constant 0 : i32
      %43 = arith.cmpi ne, %42, %c0_i32_29 : i32
      scf.if %43 {
        %c0_30 = arith.constant 0 : index
        %c0_31 = arith.constant 0 : index
        %44 = vector.load %arg8[%c0_30, %c0_31] : memref<8x1xf32, #tpu.memory_space<vmem>>, vector<8x1xf32>
        %c0_32 = arith.constant 0 : index
        %c0_33 = arith.constant 0 : index
        %45 = vector.load %arg9[%c0_32, %c0_33] : memref<8x1xf32, #tpu.memory_space<vmem>>, vector<8x1xf32>
        %46 = math.log %45 : vector<8x1xf32>
        %47 = arith.addf %44, %46 : vector<8x1xf32>
        %c0_34 = arith.constant 0 : index
        %c0_35 = arith.constant 0 : index
        %48 = vector.load %arg6[%c0_34, %c0_35] : memref<8x1xf32, #tpu.memory_space<vmem>>, vector<8x1xf32>
        tpu.vector_store %arg6[%c0_34, %c0_35], %47 {strides = array<i32>} : memref<8x1xf32, #tpu.memory_space<vmem>>, vector<8x1xf32>,
      } else {
      }
    } else {
    }
    return
  }
  func.func @transform_0(%arg0: i32, %arg1: i32, %arg2: i32) -> (i32, i32) {
    %c0_i32 = arith.constant 0 : i32
    return %arg0, %arg2 : i32, i32
  }
  func.func @transform_1(%arg0: i32, %arg1: i32, %arg2: i32) -> (i32, i32) {
    %c0_i32 = arith.constant 0 : i32
    return %arg1, %arg2 : i32, i32
  }
  func.func @transform_2(%arg0: i32, %arg1: i32, %arg2: i32) -> (i32, i32) {
    %c0_i32 = arith.constant 0 : i32
    return %arg0, %arg1 : i32, i32
  }
  func.func @transform_3(%arg0: i32, %arg1: i32, %arg2: i32) -> (i32, i32) {
    %c0_i32 = arith.constant 0 : i32
    %c0_i32_0 = arith.constant 0 : i32
    return %arg0, %c0_i32 : i32, i32
  }
}

</mosaic_0001>

<bundles_post_ra>
// kernel: tpu_custom_call.1
= control target key start
LH: loop header
LB: loop body
LE: loop exit
PB: predicated region body
PF: predicated region fallthrough
CT: control target
= control target key end

     0   :  { %vm55_vm0 = vcmask 261120   ;;  %s645_s0 = inlined_call_operand.vmem [shape: f32[8,32], index: 0, kind: input, shape index: {}]   ;;  %s646_s1 = inlined_call_operand.vmem [shape: f32[256,32], index: 1, kind: input, shape index: {}]   ;;  %s647_s2 = inlined_call_operand.hbm [shape: f32[8,256], index: 2, kind: output, shape index: {0}]   ;;  %s648_s3 = inlined_call_operand.vmem [shape: f32[8,1], index: 3, kind: output, shape index: {1}]  }
   0x1   :  { %v39_v0 = vld [vmem:[%s646_s1 + $0x80] sm:$0xff]  ;;  %v40_v1 = vld [vmem:[%s646_s1 + $0x88] sm:$0xff]  ;;  %vm497_vm1 = vmpackc.low %vm55_vm0, %vm55_vm0 }
   0x2   :  { %v23_v2 = vld [vmem:[%s646_s1] sm:$0xff]  ;;  %v377_v3 = vpack.c.bf16 %v40_v1, %v39_v0  ;;  %v24_v5 = vld [vmem:[%s646_s1 + $0x8] sm:$0xff]  ;;  %v41_v6 = vld [vmem:[%s646_s1 + $0x90] sm:$0xff] }
   0x3   :  { %v380_v7 = vpack.c.bf16 %v24_v5, %v23_v2  ;;  %v42_v8 = vld [vmem:[%s646_s1 + $0x98] sm:$0xff]  ;;  %v25_v10 = vld [vmem:[%s646_s1 + $0x10] sm:$0xff]  ;;  %v43_v12 = vld [vmem:[%s646_s1 + $0xa0] sm:$0xff] }
   0x4   :  { %379 = vmatprep.subr.msk.bf16.mxu0 %vm497_vm1, %v377_v3  ;;  %v383_v9 = vpack.c.bf16 %v42_v8, %v41_v6  ;;  %v26_v11 = vld [vmem:[%s646_s1 + $0x18] sm:$0xff]  ;;  %v44_v13 = vld [vmem:[%s646_s1 + $0xa8] sm:$0xff]  ;;  %v22_v16 = vld [vmem:[%s645_s0] sm:$0xff] }
   0x5   :  { %382 = vmatpush3.bf16.xpose.msk.msra.mxu0 %vm497_vm1, %v380_v7  ;;  %v386_v14 = vpack.c.bf16 %v26_v11, %v25_v10  ;;  %v389_v15 = vpack.c.bf16 %v44_v13, %v43_v12 }
   0x6   :  { %385 = vmatprep.subr.msk.bf16.mxu0 %vm497_vm1, %v383_v9 }
   0x7   :  { %9 = vsyncpa [#allocation6], 0  ;;  %375 = vmatprep.mubr.msk.f32.mxu0 %vm55_vm0, %v22_v16  ;;  %v27_v17 = vld [vmem:[%s646_s1 + $0x20] sm:$0xff]  ;;  %v28_v18 = vld [vmem:[%s646_s1 + $0x28] sm:$0xff]  ;;  %vm252_vm2 = vcmask 7168   ;;  %v462_v50 = vmov -inf  }
   0x8   :  { %v45_v19 = vld [vmem:[%s646_s1 + $0xb0] sm:$0xff]  ;;  %v46_v20 = vld [vmem:[%s646_s1 + $0xb8] sm:$0xff]  ;;  %v392_v21 = vpack.c.bf16 %v28_v18, %v27_v17  ;;  %v47_v25 = vld [vmem:[%s646_s1 + $0xc0] sm:$0xff]  ;;  %253 = vst.msk [vmem:[#allocation3] sm:$0xff] %vm252_vm2, %v462_v50  ;;  %v463_v54 = vmov 0   ;;  %v464_v55 = vmov 0.0  }
   0x9   :  { %v395_v22 = vpack.c.bf16 %v46_v20, %v45_v19  ;;  %v29_v23 = vld [vmem:[%s646_s1 + $0x30] sm:$0xff]  ;;  %v30_v24 = vld [vmem:[%s646_s1 + $0x38] sm:$0xff]  ;;  %v48_v26 = vld [vmem:[%s646_s1 + $0xc8] sm:$0xff]  ;;  %429 = vset.pattern.permute.xlu0 %v463_v54  ;;  %254 = vst.msk [vmem:[#allocation4] sm:$0xff] %vm252_vm2, %v464_v55 }
   0xa   :  { %v398_v27 = vpack.c.bf16 %v30_v24, %v29_v23  ;;  %v401_v28 = vpack.c.bf16 %v48_v26, %v47_v25  ;;  %v31_v29 = vld [vmem:[%s646_s1 + $0x40] sm:$0xff]  ;;  %v32_v30 = vld [vmem:[%s646_s1 + $0x48] sm:$0xff]  ;;  %v49_v31 = vld [vmem:[%s646_s1 + $0xd0] sm:$0xff] }
   0xb   :  { %v50_v32 = vld [vmem:[%s646_s1 + $0xd8] sm:$0xff]  ;;  %v404_v33 = vpack.c.bf16 %v32_v30, %v31_v29  ;;  %v33_v35 = vld [vmem:[%s646_s1 + $0x50] sm:$0xff]  ;;  %v51_v37 = vld [vmem:[%s646_s1 + $0xe0] sm:$0xff] }
   0xc   :  { %v407_v34 = vpack.c.bf16 %v50_v32, %v49_v31  ;;  %v34_v36 = vld [vmem:[%s646_s1 + $0x58] sm:$0xff]  ;;  %v52_v38 = vld [vmem:[%s646_s1 + $0xe8] sm:$0xff]  ;;  %v35_v41 = vld [vmem:[%s646_s1 + $0x60] sm:$0xff] }
   0xd   :  { %388 = vmatpush3.bf16.xpose.msk.msra.mxu0 %vm497_vm1, %v386_v14  ;;  %v410_v39 = vpack.c.bf16 %v34_v36, %v33_v35  ;;  %v413_v40 = vpack.c.bf16 %v52_v38, %v51_v37  ;;  %v36_v42 = vld [vmem:[%s646_s1 + $0x68] sm:$0xff]  ;;  %v53_v43 = vld [vmem:[%s646_s1 + $0xf0] sm:$0xff]  ;;  %v54_v44 = vld [vmem:[%s646_s1 + $0xf8] sm:$0xff] }
   0xe   :  { %391 = vmatprep.subr.msk.bf16.mxu0 %vm497_vm1, %v389_v15  ;;  %v416_v45 = vpack.c.bf16 %v36_v42, %v35_v41  ;;  %v419_v46 = vpack.c.bf16 %v54_v44, %v53_v43  ;;  %v37_v47 = vld [vmem:[%s646_s1 + $0x70] sm:$0xff]  ;;  %v38_v48 = vld [vmem:[%s646_s1 + $0x78] sm:$0xff]  ;;  %s465_s1 = smov [#allocation5]  }
   0xf   :  { %v422_v49 = vpack.c.bf16 %v38_v48, %v37_v47  ;;  %v255_v56 = vld [vmem:[#allocation3] sm:$0xff]  ;;  %s298_s22 = sshll.u32 %s465_s1, 4  ;;  %s299_s22 = int_to_ptr.vmem [resolvable:$true] %s298_s22 }
  0x10   :  { %s438_s23 = scalar_lea.vmem %s299_s22, 256  ;;  %p443_p1 = scmp.lt.s32.totalorder %s299_s22, %s299_s22 }
  0x11   :  { %p439_p0 = scmp.ne.s32.totalorder %s299_s22, %s438_s23  ;;  %p444_p2 = scmp.lt.s32.totalorder %s438_s23, %s438_s23 }
  0x13   :  { %p445_p3 = por %p444_p2, %p443_p1 }
  0x15   :  { %394 = vmatpush3.bf16.xpose.msk.msra.mxu0 %vm497_vm1, %v392_v21  ;;  %p446_p4 = pnand %p445_p3, %p439_p0 }
  0x16   :  { %397 = vmatprep.subr.msk.bf16.mxu0 %vm497_vm1, %v395_v22 }
  0x1d   :  { %400 = vmatpush3.bf16.xpose.msk.msra.mxu0 %vm497_vm1, %v398_v27 }
  0x1e   :  { %403 = vmatprep.subr.msk.bf16.mxu0 %vm497_vm1, %v401_v28 }
  0x25   :  { %406 = vmatpush3.bf16.xpose.msk.msra.mxu0 %vm497_vm1, %v404_v33 }
  0x26   :  { %409 = vmatprep.subr.msk.bf16.mxu0 %vm497_vm1, %v407_v34 }
  0x2d   :  { %412 = vmatpush3.bf16.xpose.msk.msra.mxu0 %vm497_vm1, %v410_v39 }
  0x2e   :  { %415 = vmatprep.subr.msk.bf16.mxu0 %vm497_vm1, %v413_v40 }
  0x35   :  { %418 = vmatpush3.bf16.xpose.msk.msra.mxu0 %vm497_vm1, %v416_v45 }
  0x36   :  { %421 = vmatprep.subr.msk.bf16.mxu0 %vm497_vm1, %v419_v46 }
  0x3d   :  { %424 = vmatpush3.bf16.xpose.msk.msra.mxu0 %vm497_vm1, %v422_v49 }
  0x44   :  { %376 = vmatmul.mubr.msk.f32.vlgmr.msra.gmra.mrb[0].mxu0 %vm55_vm0, %v22_v16 }
 0x117   :  { %v221_v51 = vpop.f32.mrb[0].mxu0 }
 0x118   :  { %235 = vst [vmem:[#allocation5] sm:$0xff] %v221_v51  ;;  %v223_v52 = vpop.f32.mrb[1].mxu0 }
 0x119   :  { %236 = vst [vmem:[#allocation5 + $0x8] sm:$0xff] %v223_v52  ;;  %v256_v53 = vmax.f32 %v221_v51, %v223_v52 }
 0x11b   :  { %257 = vmax.xlane.f32.xlu0 %v256_v53 }
 0x1a8   :  { %v258_v57 = vpop.xlane.xlu0 %257 }
 0x1a9   :  { %v259_v58 = vmax.f32 %v255_v56, %v258_v57 }
 0x1ab   :  { %v261_v59 = vsub.f32 %v255_v56, %v259_v58  ;;  %282 = vst.msk [vmem:[#allocation3] sm:$0xff] %vm252_vm2, %v259_v58  ;;  %267 = vperm.xlu0 %429, %v259_v58  }
 0x22a   :  { %v268_v60 = vpop.permute.xlu0 %267 }
 0x22b   :  { %v270_v61 = vsub.f32 %v221_v51, %v268_v60  ;;  %v271_v62 = vsub.f32 %v223_v52, %v268_v60 }
 0x22d   :  { %v272_v63 = vmul.f32 1.442695, %v270_v61  ;;  %v274_v0 = vmul.f32 1.442695, %v271_v62 }
 0x22f   :  { %430 = vpow2.f32 %v272_v63 }
 0x230   :  { %432 = vpow2.f32 %v274_v0 }
 0x239   :  { %v431_v1 = vpop.eup %430 }
 0x23a   :  { %v433_v2 = vpop.eup %432 }
 0x23b   :  { %v276_v3 = vadd.f32 %v433_v2, %v431_v1 }
 0x23d   :  { %277 = vadd.xlane.f32.xlu1 %v276_v3 }
 0x23e   :  { %449 = shalt.err (!%p446_p4)
}
 0x23f   :  { %s450_s26 = scalar_lea.hbm %s647_s2, 256 }
 0x240   :  { %p451_p5 = scmp.ne.s32.totalorder %s647_s2, %s450_s26  ;;  %p454_p6 = scmp.lt.u32.totalorder %s450_s26, %s647_s2 }
 0x242   :  { %p456_p7 = pnand %p454_p6, %p451_p5 }
 0x244   :  { %459 = shalt.err (!%p456_p7)
}
 0x245   :  { %301 = dma.vmem_to_hbm [thread:$0]  %s299_s22, 256, %s647_s2, [#allocation6]   ;;  %v262_v4 = vmul.f32 1.442695, %v261_v59  ;;  %v260_v6 = vld [vmem:[#allocation4] sm:$0xff]  ;;  %v286_v13 = vld [vmem:[#allocation3] sm:$0xff] }
 0x247   :  { %434 = vpow2.f32 %v262_v4 }
 0x251   :  { %v435_v5 = vpop.eup %434 }
 0x252   :  { %v264_v7 = vmul.f32 %v435_v5, %v260_v6 }
 0x2ca   :  { %v278_v8 = vpop.xlane.xlu1 %277 }
 0x2cb   :  { %v279_v9 = vadd.f32 %v278_v8, %v264_v7 }
 0x2cd   :  { %281 = vst.msk [vmem:[#allocation4] sm:$0xff] %vm252_vm2, %v279_v9 }
 0x2d4   :  { %v287_v10 = vld [vmem:[#allocation4] sm:$0xff] }
 0x2d5   :  { %436 = vlog2.f32 %v287_v10 }
 0x2df   :  { %v437_v11 = vpop.eup %436 }
 0x2e0   :  { %v289_v12 = vmul.f32 0.6931472, %v437_v11 }
 0x2e2   :  { %v290_v14 = vadd.f32 %v289_v12, %v286_v13 }
 0x2e4   :  { %291 = vst.msk [vmem:[%s648_s3] sm:$0xff] %vm252_vm2, %v290_v14 }
 0x2e5   :  { %460 = dma.done.wait [#allocation6], 256  }
 0x2e6   :  { %461 = vsyncadd [#allocation6], 4294967040 }
 0x2e7   :  { %309 = vsyncpa [#allocation6], 1 }

</bundles_post_ra>
